<compile_context>
chip_gen: v5e
topology: v5e:2x2
jax: 0.10.0
libtpu: 0.0.40
codegen_flags: <defaults>
</compile_context>

<pallas_src>
import jax
import jax.numpy as jnp
from jax.experimental import pallas as pl
from jax.experimental.pallas import tpu as pltpu

_SOFTPLUS_THRESHOLD = 20.0  # matches torch.nn.functional.softplus default


def _mish_kernel(x_ref, o_ref):
    x = x_ref[...].astype(jnp.float32)
    # Single transcendental (exp); reciprocal goes to the EUP approx path.
    e = jnp.exp(jnp.minimum(x, _SOFTPLUS_THRESHOLD))
    num = e * (e + 2.0)            # == (1 + e)^2 - 1, cancellation-free
    den = num + 2.0                # == (1 + e)^2 + 1
    t = num * pl.reciprocal(den, approx=True)
    # x > 20: softplus(x) -> x and tanh(x) == 1 in f32, so mish(x) -> x.
    y = jnp.where(x > _SOFTPLUS_THRESHOLD, x, x * t)
    o_ref[...] = y.astype(o_ref.dtype)


def _plan_slab(n, itemsize, target_block_bytes):
    """Choose (lane, rows, tile_rows, padded_size) for a lane-dense slab.

    Prefers a wide lane (up to 4096) that divides the flattened size so no
    padding copy is needed; blocks are capped at ~target_block_bytes.
    """
    lane = None
    for cand in (4096, 2048, 1024, 512, 256, 128):
        if n % cand == 0:
            lane = cand
            break
    if lane is None:               # rare: size not a multiple of 128
        lane = 128
    padded = ((n + lane - 1) // lane) * lane
    rows = padded // lane

    max_rows = max(1, target_block_bytes // (lane * itemsize))
    if rows <= max_rows:
        # Whole row axis in one block (block dim == full dim is always legal).
        return lane, rows, rows, padded

    # Largest multiple-of-8 divisor of rows within the block budget.
    t = (max_rows // 8) * 8
    while t >= 8:
        if rows % t == 0:
            return lane, rows, t, padded
        t -= 8

    # No clean divisor: pad the row axis so a budget-sized tile divides it
    # (mish(0) == 0, so zero padding is numerically safe).
    tile_rows = max(8, (max_rows // 8) * 8)
    rows = ((rows + tile_rows - 1) // tile_rows) * tile_rows
    return lane, rows, tile_rows, rows * lane


def mish(x, *, target_block_bytes=2 * 1024 * 1024):
    """Elementwise Mish. Works on any shape; NCHW conv feature maps in YOLOv4."""
    orig_shape = x.shape
    dtype = x.dtype
    n = x.size
    if n == 0:
        return x

    itemsize = jnp.dtype(dtype).itemsize
    lane, rows, tile_rows, padded = _plan_slab(n, itemsize, target_block_bytes)

    flat = x.reshape(-1)
    if padded != n:
        # Rare fallback (size not a multiple of 128 / pathological row count).
        flat = jnp.pad(flat, (0, padded - n))
    slab = flat.reshape(rows, lane)
    grid = (rows // tile_rows,)

    out = pl.pallas_call(
        _mish_kernel,
        out_shape=jax.ShapeDtypeStruct((rows, lane), dtype),
        grid_spec=pltpu.PrefetchScalarGridSpec(
            num_scalar_prefetch=0,
            grid=grid,
            in_specs=[pl.BlockSpec((tile_rows, lane), lambda i: (i, 0))],
            out_specs=pl.BlockSpec((tile_rows, lane), lambda i: (i, 0)),
        ),
        compiler_params=pltpu.CompilerParams(
            dimension_semantics=("parallel",),
            # ~2 MiB blocks, in+out double buffered ~= 8 MiB live; 48 MiB gives
            # headroom over v5e's 16 MiB scoped default while staying under
            # v7x's 64 MiB physical VMEM.
            vmem_limit_bytes=48 * 1024 * 1024,
        ),
    )(slab)

    out_flat = out.reshape(-1)
    if padded != n:
        out_flat = out_flat[:n]
    return out_flat.reshape(orig_shape)


def mish_ref(x):
    xf = x.astype(jnp.float32)
    sp = jnp.where(xf > _SOFTPLUS_THRESHOLD, xf,
                   jnp.log1p(jnp.exp(jnp.minimum(xf, _SOFTPLUS_THRESHOLD))))
    return (xf * jnp.tanh(sp)).astype(x.dtype)


def _check(y, y_ref, name):
    assert y.shape == y_ref.shape and y.dtype == y_ref.dtype, name
    yf = y.astype(jnp.float32)
    rf = y_ref.astype(jnp.float32)
    # Relative-style tolerance: the approx reciprocal trades a few ULPs of
    # precision for EUP throughput (error is far below this bound in practice).
    err = float(jnp.max(jnp.abs(yf - rf) / jnp.maximum(jnp.abs(rf), 1.0)))
    assert err < 1e-2, f"{name}: max error {err}"


if __name__ == "__main__":
    key = jax.random.PRNGKey(0)

    # NCHW input, as a conv feature map would be in the YOLOv4 CSPDarknet.
    x = jax.random.normal(key, (2, 4, 16, 16), dtype=jnp.float32) * 3.0
    y = mish(x)
    jax.block_until_ready(y)
    _check(y, mish_ref(x), "main")

    # Secondary check: odd size (exercises padding fallback) and a tiny block
    # budget (exercises the multi-step grid path).
    x2 = jax.random.normal(jax.random.PRNGKey(0), (2, 3, 17, 19),
                           dtype=jnp.float32) * 3.0
    y2 = mish(x2, target_block_bytes=4 * 1024)
    jax.block_until_ready(y2)
    _check(y2, mish_ref(x2), "padded/multiblock")

    print("KERNEL_OK")
</pallas_src>

<mosaic_0001>
module attributes {stable_mosaic.version = 11 : i64} {
  func.func @_mish_kernel(%arg0: i32, %arg1: memref<1x2048xf32, #tpu.memory_space<vmem>>, %arg2: memref<1x2048xf32, #tpu.memory_space<vmem>>) attributes {dimension_semantics = [#tpu.dimension_semantics<parallel>], iteration_bounds = array<i64: 1>, scalar_prefetch = 0 : i64, scratch_operands = 0 : i64, tpu.core_type = #tpu.core_type<tc>, window_params = [{transform_indices = @transform_0, window_bounds = array<i64: 1, 2048>}, {transform_indices = @transform_1, window_bounds = array<i64: 1, 2048>}]} {
    %c0 = arith.constant 0 : index
    %c0_0 = arith.constant 0 : index
    %0 = vector.load %arg1[%c0, %c0_0] : memref<1x2048xf32, #tpu.memory_space<vmem>>, vector<1x2048xf32>
    %cst = arith.constant 2.000000e+01 : f32
    %1 = vector.broadcast %cst : f32 to vector<1x2048xf32>
    %2 = arith.minimumf %0, %1 : vector<1x2048xf32>
    %3 = math.exp %2 : vector<1x2048xf32>
    %cst_1 = arith.constant 2.000000e+00 : f32
    %4 = vector.broadcast %cst_1 : f32 to vector<1x2048xf32>
    %5 = arith.addf %3, %4 : vector<1x2048xf32>
    %6 = arith.mulf %3, %5 : vector<1x2048xf32>
    %cst_2 = arith.constant 2.000000e+00 : f32
    %7 = vector.broadcast %cst_2 : f32 to vector<1x2048xf32>
    %8 = arith.addf %6, %7 : vector<1x2048xf32>
    %9 = tpu.reciprocal %8 {approx = true} : vector<1x2048xf32> -> vector<1x2048xf32>
    %10 = arith.mulf %6, %9 : vector<1x2048xf32>
    %cst_3 = arith.constant 2.000000e+01 : f32
    %11 = vector.broadcast %cst_3 : f32 to vector<1x2048xf32>
    %12 = arith.cmpf ogt, %0, %11 : vector<1x2048xf32>
    %13 = arith.mulf %0, %10 : vector<1x2048xf32>
    %14 = arith.select %12, %0, %13 : vector<1x2048xi1>, vector<1x2048xf32>
    %c0_4 = arith.constant 0 : index
    %c0_5 = arith.constant 0 : index
    %15 = vector.load %arg2[%c0_4, %c0_5] : memref<1x2048xf32, #tpu.memory_space<vmem>>, vector<1x2048xf32>
    tpu.vector_store %arg2[%c0_4, %c0_5], %14 {strides = array<i32>} : memref<1x2048xf32, #tpu.memory_space<vmem>>, vector<1x2048xf32>,
    return
  }
  func.func @transform_0(%arg0: i32) -> (i32, i32) {
    %c0_i32 = arith.constant 0 : i32
    %c0_i32_0 = arith.constant 0 : i32
    return %arg0, %c0_i32 : i32, i32
  }
  func.func @transform_1(%arg0: i32) -> (i32, i32) {
    %c0_i32 = arith.constant 0 : i32
    %c0_i32_0 = arith.constant 0 : i32
    return %arg0, %c0_i32 : i32, i32
  }
}

</mosaic_0001>

<bundles_post_ra>
// kernel: tpu_custom_call.1
= control target key start
LH: loop header
LB: loop body
LE: loop exit
PB: predicated region body
PF: predicated region fallthrough
CT: control target
= control target key end

     0   :  { %6 = vsyncpa [#allocation3], 0  ;;  %s146_s0 = inlined_call_operand.hbm [shape: f32[1,2048], index: 0, kind: input, shape index: {}]   ;;  %s147_s1 = inlined_call_operand.hbm [shape: f32[1,2048], index: 1, kind: output, shape index: {}]  }
   0x1   :  { %7 = vsyncpa [#allocation4], 0  ;;  %s13_s8 = sshll.u32 %s146_s0, 4  ;;  %s128_s9 = smov [#allocation2]   ;;  %s14_s8 = int_to_ptr.hbm [resolvable:$true] %s13_s8 }
   0x2   :  { %s15_s10 = sshll.u32 %s128_s9, 4  ;;  %s16_s10 = int_to_ptr.vmem [resolvable:$true] %s15_s10 }
   0x3   :  { %18 = dma.hbm_to_vmem [thread:$0]  %s14_s8, 256, %s16_s10, [#allocation3]  }
   0x4   :  { %124 = dma.done.wait [#allocation3], 256  }
   0x5   :  { %125 = vsyncadd [#allocation3], 4294967040  ;;  %v23_v0 = vld [vmem:[#allocation2] sm:$0xff]  ;;  %v24_v1 = vld [vmem:[#allocation2 + $0x8] sm:$0xff]  ;;  %s129_s0 = smov [#allocation5]   ;;  %s56_s14 = sshll.u32 %s147_s1, 4  ;;  %s57_s14 = int_to_ptr.hbm [resolvable:$true] %s56_s14 }
   0x6   :  { %v25_v2 = vmin.f32 %v23_v0, 20.0  ;;  %v26_v3 = vmin.f32 %v24_v1, 20.0  ;;  %vm41_vm0 = vcmp.gt.f32.partialorder %v23_v0, 20.0  ;;  %s54_s11 = sshll.u32 %s129_s0, 4  ;;  %vm42_vm1 = vcmp.gt.f32.partialorder %v24_v1, 20.0  ;;  %s55_s11 = int_to_ptr.vmem [resolvable:$true] %s54_s11 }
   0x8   :  { %v27_v4 = vmul.f32 1.442695, %v25_v2  ;;  %v29_v5 = vmul.f32 1.442695, %v26_v3 }
   0xa   :  { %68 = vpow2.f32 %v27_v4 }
   0xb   :  { %70 = vpow2.f32 %v29_v5 }
  0x10   :  { %v69_v6 = vpop.eup %68 }
  0x11   :  { %v71_v7 = vpop.eup %70  ;;  %v31_v8 = vadd.f32 2.0, %v69_v6 }
  0x12   :  { %v32_v9 = vadd.f32 2.0, %v71_v7 }
  0x13   :  { %v33_v10 = vmul.f32 %v69_v6, %v31_v8 }
  0x14   :  { %v34_v11 = vmul.f32 %v71_v7, %v32_v9 }
  0x15   :  { %v35_v12 = vadd.f32 2.0, %v33_v10 }
  0x16   :  { %v36_v13 = vadd.f32 2.0, %v34_v11 }
  0x17   :  { %72 = vrcp.f32 %v35_v12 }
  0x18   :  { %74 = vrcp.f32 %v36_v13 }
  0x1d   :  { %v73_v14 = vpop.eup %72 }
  0x1e   :  { %v75_v15 = vpop.eup %74  ;;  %v39_v16 = vmul.f32 %v73_v14, %v33_v10 }
  0x1f   :  { %v40_v17 = vmul.f32 %v75_v15, %v34_v11 }
  0x20   :  { %v43_v18 = vmul.f32 %v39_v16, %v23_v0 }
  0x21   :  { %v44_v19 = vmul.f32 %v40_v17, %v24_v1 }
  0x22   :  { %v45_v20 = vsel %vm41_vm0, %v23_v0, %v43_v18 }
  0x23   :  { %47 = vst [vmem:[#allocation5] sm:$0xff] %v45_v20  ;;  %v46_v21 = vsel %vm42_vm1, %v24_v1, %v44_v19 }
  0x24   :  { %48 = vst [vmem:[#allocation5 + $0x8] sm:$0xff] %v46_v21 }
  0x25   :  { %59 = dma.vmem_to_hbm [thread:$0]  %s55_s11, 256, %s57_s14, [#allocation4]  }
  0x26   :  { %126 = dma.done.wait [#allocation4], 256  }
  0x27   :  { %127 = vsyncadd [#allocation4], 4294967040 }
  0x28   :  { %64 = vsyncpa [#allocation3], 1 }
  0x29   :  { %65 = vsyncpa [#allocation4], 1 }

</bundles_post_ra>
